<compile_context>
chip_gen: v5e
topology: v5e:2x2
jax: 0.10.0
libtpu: 0.0.40
codegen_flags: <defaults>
</compile_context>

<pallas_src>
import functools

import jax
import jax.numpy as jnp
from jax.experimental import pallas as pl
from jax.experimental.pallas import tpu as pltpu

HIDDEN1 = 128
HIDDEN2 = 256
LANE = 128  # lane width used only for the (internal) padded w3 dot


def _round_up(n, m):
    return pl.cdiv(n, m) * m


def mlp_kernel(x_ref, w1_ref, b1_ref, w2_ref, b2_ref, w3_ref, b3_ref, o_ref,
               *, num_actions):
    # x arrives as f32; cast to bf16 in-register (free VPU filler) for the MXU.
    x = x_ref[...].astype(jnp.bfloat16)
    # fc1 + ReLU   (bf16 x bf16 -> f32 accumulate on the MXU)
    h1 = jnp.dot(x, w1_ref[...], preferred_element_type=jnp.float32)
    h1 = jnp.maximum(h1 + b1_ref[...], 0.0)
    # fc2 + ReLU
    h2 = jnp.dot(h1.astype(jnp.bfloat16), w2_ref[...],
                 preferred_element_type=jnp.float32)
    h2 = jnp.maximum(h2 + b2_ref[...], 0.0)
    # out layer: dot against lane-padded w3, then slice to the real width so
    # only num_actions columns are written back to HBM.
    out = jnp.dot(h2.astype(jnp.bfloat16), w3_ref[...],
                  preferred_element_type=jnp.float32)
    o_ref[...] = (out[:, :num_actions] + b3_ref[...]).astype(o_ref.dtype)


def prepare_params(params):
    """One-time (per parameter set) kernel-side packing of the weights.

    Casts weights to bf16, lane-pads the fc3 weight to 128 columns for the MXU,
    and keeps biases in f32 (added after f32 accumulation).
    """
    num_states = params["w1"].shape[0]
    num_actions = params["w3"].shape[1]
    n_pad = int(_round_up(num_actions, LANE))

    w1 = params["w1"].astype(jnp.bfloat16)
    w2 = params["w2"].astype(jnp.bfloat16)
    w3p = jnp.zeros((HIDDEN2, n_pad), jnp.bfloat16)
    w3p = w3p.at[:, :num_actions].set(params["w3"].astype(jnp.bfloat16))
    b1 = params["b1"].astype(jnp.float32)
    b2 = params["b2"].astype(jnp.float32)
    b3 = params["b3"].astype(jnp.float32)  # unpadded: (1, num_actions)

    return dict(w1=w1, b1=b1, w2=w2, b2=b2, w3p=w3p, b3=b3,
                num_states=num_states, num_actions=num_actions, n_pad=n_pad)


def net_forward(x, prepared, *, batch_tile=2048):
    """x: (B, num_states) float32. prepared: output of prepare_params()."""
    B, num_states = x.shape
    assert num_states == prepared["num_states"]
    num_actions = prepared["num_actions"]
    n_pad = prepared["n_pad"]

    # Batch handling: pad only to a multiple of 8 sublanes; ragged last block
    # (when tile does not divide B_pad) is handled by Pallas.
    B_pad = int(_round_up(B, 8))
    if B_pad != B:
        x = jnp.pad(x, ((0, B_pad - B), (0, 0)))

    # Tile: multiple of 8, capped at batch_tile and at B_pad; prefer >= 2 grid
    # steps so dimension_semantics=("parallel",) can shard across v7x's 2 TCs.
    bt = int(_round_up(int(batch_tile), 8))
    tile = min(bt, int(_round_up(pl.cdiv(B_pad, 2), 8)))
    tile = max(8, min(tile, B_pad))
    grid = (pl.cdiv(B_pad, tile),)

    in_specs = [
        pl.BlockSpec((tile, num_states), lambda i: (i, 0)),     # x (tiled on batch)
        pl.BlockSpec((num_states, HIDDEN1), lambda i: (0, 0)),  # w1 (resident)
        pl.BlockSpec((1, HIDDEN1), lambda i: (0, 0)),           # b1
        pl.BlockSpec((HIDDEN1, HIDDEN2), lambda i: (0, 0)),     # w2
        pl.BlockSpec((1, HIDDEN2), lambda i: (0, 0)),           # b2
        pl.BlockSpec((HIDDEN2, n_pad), lambda i: (0, 0)),       # w3 (lane-padded)
        pl.BlockSpec((1, num_actions), lambda i: (0, 0)),       # b3 (unpadded)
    ]
    # Output: only the real num_actions columns (last dim == full array dim).
    out_specs = pl.BlockSpec((tile, num_actions), lambda i: (i, 0))

    weight_bytes = (num_states * HIDDEN1 + HIDDEN1 * HIDDEN2 + HIDDEN2 * n_pad) * 2 \
        + (HIDDEN1 + HIDDEN2 + num_actions) * 4
    cost = pl.CostEstimate(
        flops=2 * B_pad * (num_states * HIDDEN1 + HIDDEN1 * HIDDEN2 + HIDDEN2 * n_pad),
        transcendentals=0,
        bytes_accessed=B_pad * num_states * 4 + weight_bytes + B_pad * num_actions * 4,
    )

    out = pl.pallas_call(
        functools.partial(mlp_kernel, num_actions=num_actions),
        out_shape=jax.ShapeDtypeStruct((B_pad, num_actions), jnp.float32),
        grid=grid,
        in_specs=in_specs,
        out_specs=out_specs,
        compiler_params=pltpu.CompilerParams(
            dimension_semantics=("parallel",),
        ),
        cost_estimate=cost,
    )(x, prepared["w1"], prepared["b1"], prepared["w2"], prepared["b2"],
      prepared["w3p"], prepared["b3"])

    # Slice off only the (<=7 row) batch padding.
    return out[:B] if B_pad != B else out


def init_params(key, num_states, num_actions):
    """Deterministic init mirroring the module: W ~ N(0, 0.1), small uniform biases."""
    k1, k2, k3, k4, k5, k6 = jax.random.split(key, 6)
    # Stored transposed as (in, out) so the kernel computes x @ W + b.
    w1 = 0.1 * jax.random.normal(k1, (num_states, HIDDEN1), jnp.float32)
    w2 = 0.1 * jax.random.normal(k2, (HIDDEN1, HIDDEN2), jnp.float32)
    w3 = 0.1 * jax.random.normal(k3, (HIDDEN2, num_actions), jnp.float32)
    b1 = 0.01 * jax.random.uniform(k4, (1, HIDDEN1), jnp.float32, -1.0, 1.0)
    b2 = 0.01 * jax.random.uniform(k5, (1, HIDDEN2), jnp.float32, -1.0, 1.0)
    b3 = 0.01 * jax.random.uniform(k6, (1, num_actions), jnp.float32, -1.0, 1.0)
    return dict(w1=w1, b1=b1, w2=w2, b2=b2, w3=w3, b3=b3)


def reference_forward(x, p):
    """Pure-JAX reference with the same bf16-input / f32-accumulate quantization."""
    xb = x.astype(jnp.bfloat16)
    w1 = p["w1"].astype(jnp.bfloat16)
    w2 = p["w2"].astype(jnp.bfloat16)
    w3 = p["w3"].astype(jnp.bfloat16)
    h1 = jnp.maximum(
        jnp.dot(xb, w1, preferred_element_type=jnp.float32) + p["b1"], 0.0)
    h2 = jnp.maximum(
        jnp.dot(h1.astype(jnp.bfloat16), w2,
                preferred_element_type=jnp.float32) + p["b2"], 0.0)
    return jnp.dot(h2.astype(jnp.bfloat16), w3,
                   preferred_element_type=jnp.float32) + p["b3"]


if __name__ == "__main__":
    num_states = 16
    num_actions = 4
    batch = 64  # small demo shape; batch need not divide the tile

    key = jax.random.PRNGKey(0)
    kx, kp = jax.random.split(key)
    x = jax.random.normal(kx, (batch, num_states), jnp.float32)
    params = init_params(kp, num_states, num_actions)

    prepared = prepare_params(params)  # hoisted: once per parameter set
    out = net_forward(x, prepared, batch_tile=2048)
    out = jax.block_until_ready(out)

    ref = reference_forward(x, params)
    assert out.shape == (batch, num_actions)
    assert jnp.allclose(out, ref, atol=2e-2, rtol=2e-2), "mismatch vs reference"

    print("KERNEL_OK")
</pallas_src>

<mosaic_0001>
module attributes {stable_mosaic.version = 11 : i64} {
  func.func @mlp_kernel(%arg0: i32, %arg1: memref<32x16xf32, #tpu.memory_space<vmem>>, %arg2: memref<16x128xbf16, #tpu.memory_space<vmem>>, %arg3: memref<1x128xf32, #tpu.memory_space<vmem>>, %arg4: memref<128x256xbf16, #tpu.memory_space<vmem>>, %arg5: memref<1x256xf32, #tpu.memory_space<vmem>>, %arg6: memref<256x128xbf16, #tpu.memory_space<vmem>>, %arg7: memref<1x4xf32, #tpu.memory_space<vmem>>, %arg8: memref<32x4xf32, #tpu.memory_space<vmem>>) attributes {dimension_semantics = [#tpu.dimension_semantics<parallel>], iteration_bounds = array<i64: 2>, scalar_prefetch = 0 : i64, scratch_operands = 0 : i64, tpu.core_type = #tpu.core_type<tc>, window_params = [{transform_indices = @transform_0, window_bounds = array<i64: 32, 16>}, {pipeline_mode = #tpu.pipeline_mode<synchronous>, transform_indices = @transform_1, window_bounds = array<i64: 16, 128>}, {pipeline_mode = #tpu.pipeline_mode<synchronous>, transform_indices = @transform_2, window_bounds = array<i64: 1, 128>}, {pipeline_mode = #tpu.pipeline_mode<synchronous>, transform_indices = @transform_3, window_bounds = array<i64: 128, 256>}, {pipeline_mode = #tpu.pipeline_mode<synchronous>, transform_indices = @transform_4, window_bounds = array<i64: 1, 256>}, {pipeline_mode = #tpu.pipeline_mode<synchronous>, transform_indices = @transform_5, window_bounds = array<i64: 256, 128>}, {pipeline_mode = #tpu.pipeline_mode<synchronous>, transform_indices = @transform_6, window_bounds = array<i64: 1, 4>}, {transform_indices = @transform_7, window_bounds = array<i64: 32, 4>}]} {
    %c0 = arith.constant 0 : index
    %c0_0 = arith.constant 0 : index
    %0 = vector.load %arg1[%c0, %c0_0] : memref<32x16xf32, #tpu.memory_space<vmem>>, vector<32x16xf32>
    %1 = arith.truncf %0 : vector<32x16xf32> to vector<32x16xbf16>
    %c0_1 = arith.constant 0 : index
    %c0_2 = arith.constant 0 : index
    %2 = vector.load %arg2[%c0_1, %c0_2] : memref<16x128xbf16, #tpu.memory_space<vmem>>, vector<16x128xbf16>
    %cst = arith.constant dense<0.000000e+00> : vector<32x128xf32>
    %3 = tpu.matmul %1, %2, %cst {dimension_numbers = #tpu.dot_dimension_numbers<[1], [0], [0], [1], [0, 0, 1, 1], [], []>} : vector<32x16xbf16>, vector<16x128xbf16>, vector<32x128xf32> -> vector<32x128xf32>
    %c0_3 = arith.constant 0 : index
    %c0_4 = arith.constant 0 : index
    %4 = vector.load %arg3[%c0_3, %c0_4] : memref<1x128xf32, #tpu.memory_space<vmem>>, vector<1x128xf32>
    %5 = vector.broadcast %4 : vector<1x128xf32> to vector<32x128xf32>
    %6 = arith.addf %3, %5 : vector<32x128xf32>
    %cst_5 = arith.constant 0.000000e+00 : f32
    %7 = vector.broadcast %cst_5 : f32 to vector<32x128xf32>
    %8 = arith.maximumf %6, %7 : vector<32x128xf32>
    %9 = arith.truncf %8 : vector<32x128xf32> to vector<32x128xbf16>
    %c0_6 = arith.constant 0 : index
    %c0_7 = arith.constant 0 : index
    %10 = vector.load %arg4[%c0_6, %c0_7] : memref<128x256xbf16, #tpu.memory_space<vmem>>, vector<128x256xbf16>
    %cst_8 = arith.constant dense<0.000000e+00> : vector<32x256xf32>
    %11 = tpu.matmul %9, %10, %cst_8 {dimension_numbers = #tpu.dot_dimension_numbers<[1], [0], [0], [1], [0, 0, 1, 1], [], []>} : vector<32x128xbf16>, vector<128x256xbf16>, vector<32x256xf32> -> vector<32x256xf32>
    %c0_9 = arith.constant 0 : index
    %c0_10 = arith.constant 0 : index
    %12 = vector.load %arg5[%c0_9, %c0_10] : memref<1x256xf32, #tpu.memory_space<vmem>>, vector<1x256xf32>
    %13 = vector.broadcast %12 : vector<1x256xf32> to vector<32x256xf32>
    %14 = arith.addf %11, %13 : vector<32x256xf32>
    %cst_11 = arith.constant 0.000000e+00 : f32
    %15 = vector.broadcast %cst_11 : f32 to vector<32x256xf32>
    %16 = arith.maximumf %14, %15 : vector<32x256xf32>
    %17 = arith.truncf %16 : vector<32x256xf32> to vector<32x256xbf16>
    %c0_12 = arith.constant 0 : index
    %c0_13 = arith.constant 0 : index
    %18 = vector.load %arg6[%c0_12, %c0_13] : memref<256x128xbf16, #tpu.memory_space<vmem>>, vector<256x128xbf16>
    %cst_14 = arith.constant dense<0.000000e+00> : vector<32x128xf32>
    %19 = tpu.matmul %17, %18, %cst_14 {dimension_numbers = #tpu.dot_dimension_numbers<[1], [0], [0], [1], [0, 0, 1, 1], [], []>} : vector<32x256xbf16>, vector<256x128xbf16>, vector<32x128xf32> -> vector<32x128xf32>
    %20 = vector.extract_strided_slice %19 {offsets = [0, 0], sizes = [32, 4], strides = [1, 1]} : vector<32x128xf32> to vector<32x4xf32>
    %c0_15 = arith.constant 0 : index
    %c0_16 = arith.constant 0 : index
    %21 = vector.load %arg7[%c0_15, %c0_16] : memref<1x4xf32, #tpu.memory_space<vmem>>, vector<1x4xf32>
    %22 = vector.broadcast %21 : vector<1x4xf32> to vector<32x4xf32>
    %23 = arith.addf %20, %22 : vector<32x4xf32>
    %c0_17 = arith.constant 0 : index
    %c0_18 = arith.constant 0 : index
    %24 = vector.load %arg8[%c0_17, %c0_18] : memref<32x4xf32, #tpu.memory_space<vmem>>, vector<32x4xf32>
    tpu.vector_store %arg8[%c0_17, %c0_18], %23 {strides = array<i32>} : memref<32x4xf32, #tpu.memory_space<vmem>>, vector<32x4xf32>,
    return
  }
  func.func @transform_0(%arg0: i32) -> (i32, i32) {
    %c0_i32 = arith.constant 0 : i32
    %c0_i32_0 = arith.constant 0 : i32
    return %arg0, %c0_i32 : i32, i32
  }
  func.func @transform_1(%arg0: i32) -> (i32, i32) {
    %c0_i32 = arith.constant 0 : i32
    %c0_i32_0 = arith.constant 0 : i32
    %c0_i32_1 = arith.constant 0 : i32
    return %c0_i32, %c0_i32_0 : i32, i32
  }
  func.func @transform_2(%arg0: i32) -> (i32, i32) {
    %c0_i32 = arith.constant 0 : i32
    %c0_i32_0 = arith.constant 0 : i32
    %c0_i32_1 = arith.constant 0 : i32
    return %c0_i32, %c0_i32_0 : i32, i32
  }
  func.func @transform_3(%arg0: i32) -> (i32, i32) {
    %c0_i32 = arith.constant 0 : i32
    %c0_i32_0 = arith.constant 0 : i32
    %c0_i32_1 = arith.constant 0 : i32
    return %c0_i32, %c0_i32_0 : i32, i32
  }
  func.func @transform_4(%arg0: i32) -> (i32, i32) {
    %c0_i32 = arith.constant 0 : i32
    %c0_i32_0 = arith.constant 0 : i32
    %c0_i32_1 = arith.constant 0 : i32
    return %c0_i32, %c0_i32_0 : i32, i32
  }
  func.func @transform_5(%arg0: i32) -> (i32, i32) {
    %c0_i32 = arith.constant 0 : i32
    %c0_i32_0 = arith.constant 0 : i32
    %c0_i32_1 = arith.constant 0 : i32
    return %c0_i32, %c0_i32_0 : i32, i32
  }
  func.func @transform_6(%arg0: i32) -> (i32, i32) {
    %c0_i32 = arith.constant 0 : i32
    %c0_i32_0 = arith.constant 0 : i32
    %c0_i32_1 = arith.constant 0 : i32
    return %c0_i32, %c0_i32_0 : i32, i32
  }
  func.func @transform_7(%arg0: i32) -> (i32, i32) {
    %c0_i32 = arith.constant 0 : i32
    %c0_i32_0 = arith.constant 0 : i32
    return %arg0, %c0_i32 : i32, i32
  }
}

</mosaic_0001>

<bundles_post_ra>
// kernel: tpu_custom_call.1
= control target key start
LH: loop header
LB: loop body
LE: loop exit
PB: predicated region body
PF: predicated region fallthrough
CT: control target
= control target key end

     0   :  { %12 = vsyncpa [#allocation3], 0  ;;  %s1191_s0 = inlined_call_operand.vmem [shape: f32[64,16], index: 0, kind: input, shape index: {}]   ;;  %s1192_s1 = inlined_call_operand.vmem [shape: bf16[16,128], index: 1, kind: input, shape index: {}]   ;;  %s1193_s2 = inlined_call_operand.vmem [shape: f32[1,128], index: 2, kind: input, shape index: {}]   ;;  %s1194_s3 = inlined_call_operand.hbm [shape: bf16[128,256], index: 3, kind: input, shape index: {}]   ;;  %s1195_s4 = inlined_call_operand.vmem [shape: f32[1,256], index: 4, kind: input, shape index: {}]   ;;  %s1196_s5 = inlined_call_operand.hbm [shape: bf16[256,128], index: 5, kind: input, shape index: {}]   ;;  %s1197_s6 = inlined_call_operand.vmem [shape: f32[1,4], index: 6, kind: input, shape index: {}]   ;;  %s1198_s7 = inlined_call_operand.vmem [shape: f32[64,4], index: 7, kind: output, shape index: {}]  }
   0x1   :  { %13 = vsyncpa [#allocation5], 0  ;;  %s1115_s24 = smov 0  }
   0x2 LB: > { %s219_s27 = sshll.u32 %s1194_s3, 4  ;;  %s776_s28 = sadd.s32 4294967295, %s1067_s24   ;;  %s1067_s24 = sphi %s1115_s24, %s19_s24   ;;  %s220_s27 = int_to_ptr.hbm [resolvable:$true] %s219_s27 }
   0x3   : > { %p778_p0 = scmp.ge.s32.totalorder %s1067_s24, 1  ;;  %p202_p1 = scmp.lt.s32.totalorder %s1067_s24, 3 }
   0x4   : > { %p1126_p2 = scmp.eq.s32.totalorder %s776_s28, 0  ;;  %s1069_s8 = smov [#allocation2]  }
   0x5   : > { %p1130_p3 = pnand %p778_p0, %p202_p1  ;;  %s221_s9 = sshll.u32 %s1069_s8, 4  ;;  %s222_s9 = int_to_ptr.vmem [resolvable:$true] %s221_s9 }
   0x6   : > { %s236_s12 = sshll.u32 %s1196_s5, 4  ;;  %s1070_s13 = smov [#allocation4]   ;;  %s237_s12 = int_to_ptr.hbm [resolvable:$true] %s236_s12 }
   0x7   : > { %p966_p4 = pneg %p1130_p3  ;;  %s238_s14 = sshll.u32 %s1070_s13, 4  ;;  %s239_s14 = int_to_ptr.vmem [resolvable:$true] %s238_s14 }
   0x8   : > { %s1071_s15 = smov 128   ;;  %s1072_s16 = smov 8  }
   0x9   : > { %p967_p5 = pnand %p1126_p2, %p966_p4  ;;  %s1073_s17 = smov 64  }
   0xa   : > { %s1074_s18 = smov 4   ;;  %266 = sbr.rel (%p1130_p3) target bundleno = 468 (0x1d4), region = 48 }
   0xb   : > { %969 = dma.hbm_to_vmem [thread:$0]  (!%p967_p5), %s220_s27, 2048, %s222_s9, [#allocation3], %s1071_s15, %s1071_s15, %s1072_s16  }
   0xc   : > { %972 = dma.hbm_to_vmem [thread:$0]  (!%p967_p5), %s237_s12, 2048, %s239_s14, [#allocation5], %s1073_s17, %s1073_s17, %s1074_s18  }
   0xf   : > { %1058 = dma.done.wait (%p1126_p2), [#allocation3], 2048  }
  0x10   : > { %1060 = vsyncadd (%p1126_p2), [#allocation3], 4294965248 }
  0x11   : > { %1062 = dma.done.wait (%p1126_p2), [#allocation5], 2048  }
  0x12   : > { %1064 = vsyncadd (%p1126_p2), [#allocation5], 4294965248  ;;  %s785_s19 = sshll.u32 %s776_s28, 2  ;;  %v925_v0 = vld [vmem:[%s1192_s1] sm:$0xff]  ;;  %vm335_vm0 = vcmask 130048   ;;  %v949_v55 = vld [vmem:[#allocation4 + $0x38] sm:$0xff] }
  0x13   : > { %p305_p6 = scmp.lt.s32.totalorder %s785_s19, 7  ;;  %v853_v4 = vld [vmem:[#allocation2 + $0x70] sm:$0xf]  ;;  %349 = vmatpush.bf16.msra.mxu0 %v925_v0  ;;  %v941_v5 = vld [vmem:[#allocation2 + $0x74] sm:$0xf0]  ;;  %647 = vmatpush.bf16.msra.mxu3 %v949_v55  ;;  %v947_v61 = vld [vmem:[#allocation4 + $0x28] sm:$0xff] }
  0x14   : > { %v940_v6 = vld [vmem:[#allocation2 + $0x74] sm:$0xf]  ;;  %v855_v7 = vld [vmem:[#allocation2 + $0x78] sm:$0xf0]  ;;  %v854_v8 = vor.u32 %v941_v5, %v853_v4  ;;  %v845_v10 = vld [vmem:[#allocation2 + $0x60] sm:$0xf] }
  0x15   : > { %s1202_s19 = smov (!%p305_p6, %s785_s19), 7  ;;  %v858_v9 = vor.u32 %v940_v6, %v855_v7  ;;  %v939_v11 = vld [vmem:[#allocation2 + $0x64] sm:$0xf0]  ;;  %v938_v12 = vld [vmem:[#allocation2 + $0x64] sm:$0xf]  ;;  %v957_v56 = vld [vmem:[#allocation4 + $0x78] sm:$0xff] }
  0x16   : > { %s786_s20 = sshll.u32 %s1202_s19, 3  ;;  %v847_v13 = vld [vmem:[#allocation2 + $0x68] sm:$0xf0]  ;;  %469 = vmatpush.bf16.msra.mxu1 %v854_v8  ;;  %v846_v14 = vor.u32 %v939_v11, %v845_v10  ;;  %v837_v16 = vld [vmem:[#allocation2 + $0x50] sm:$0xf]  ;;  %vm693_vm1 = vcmask 31744  }
  0x17   : > { %s1159_s23 = scalar_lea.vmem %s1191_s0, %s786_s20  ;;  %488 = vmatpush.bf16.msra.mxu2 %v858_v9  ;;  %v850_v15 = vor.u32 %v938_v12, %v847_v13  ;;  %v937_v17 = vld [vmem:[#allocation2 + $0x54] sm:$0xf0]  ;;  %v936_v18 = vld [vmem:[#allocation2 + $0x54] sm:$0xf]  ;;  %v839_v19 = vld [vmem:[#allocation2 + $0x58] sm:$0xf0]  ;;  %666 = vmatpush.bf16.msrb.mxu0 %v957_v56  ;;  %s314_s12 = scalar_lea.vmem %s1198_s7, %s786_s20 }
  0x18   : > { %v317_v1 = vld [vmem:[%s1159_s23] sm:$0xff]  ;;  %v318_v2 = vld [vmem:[%s1159_s23 + $0x8] sm:$0xff]  ;;  %v838_v20 = vor.u32 %v937_v17, %v837_v16  ;;  %v842_v21 = vor.u32 %v936_v18, %v839_v19  ;;  %v319_v27 = vld [vmem:[%s1159_s23 + $0x10] sm:$0xff] }
  0x19   : > { %v321_v3 = vpack.c.bf16 %v318_v2, %v317_v1  ;;  %v829_v22 = vld [vmem:[#allocation2 + $0x40] sm:$0xf]  ;;  %v935_v23 = vld [vmem:[#allocation2 + $0x44] sm:$0xf0]  ;;  %v934_v24 = vld [vmem:[#allocation2 + $0x44] sm:$0xf] }
  0x1a   : > { %470 = vmatpush.bf16.msra.mxu1 %v846_v14  ;;  %v831_v25 = vld [vmem:[#allocation2 + $0x48] sm:$0xf0]  ;;  %v830_v26 = vor.u32 %v935_v23, %v829_v22  ;;  %v320_v28 = vld [vmem:[%s1159_s23 + $0x18] sm:$0xff]  ;;  %v821_v31 = vld [vmem:[#allocation2 + $0x30] sm:$0xf] }
  0x1b   : > { %793 = vmatmul.msk.bf16.vlgmr.msra.gmra.mxu0 %vm335_vm0, %v321_v3  ;;  %489 = vmatpush.bf16.msra.mxu2 %v850_v15  ;;  %v834_v29 = vor.u32 %v934_v24, %v831_v25  ;;  %v322_v30 = vpack.c.bf16 %v320_v28, %v319_v27  ;;  %v933_v32 = vld [vmem:[#allocation2 + $0x34] sm:$0xf0]  ;;  %v932_v33 = vld [vmem:[#allocation2 + $0x34] sm:$0xf]  ;;  %v823_v35 = vld [vmem:[#allocation2 + $0x38] sm:$0xf0] }
  0x1c   : > { %v822_v34 = vor.u32 %v933_v32, %v821_v31  ;;  %v826_v36 = vor.u32 %v932_v33, %v823_v35  ;;  %v813_v37 = vld [vmem:[#allocation2 + $0x20] sm:$0xf]  ;;  %v931_v38 = vld [vmem:[#allocation2 + $0x24] sm:$0xf0]  ;;  %v930_v39 = vld [vmem:[#allocation2 + $0x24] sm:$0xf] }
  0x1d   : > { %v814_v40 = vor.u32 %v931_v38, %v813_v37  ;;  %v815_v41 = vld [vmem:[#allocation2 + $0x28] sm:$0xf0]  ;;  %v805_v43 = vld [vmem:[#allocation2 + $0x10] sm:$0xf]  ;;  %v929_v44 = vld [vmem:[#allocation2 + $0x14] sm:$0xf0] }
  0x1e   : > { %471 = vmatpush.bf16.msra.mxu1 %v838_v20  ;;  %v818_v42 = vor.u32 %v930_v39, %v815_v41  ;;  %v928_v45 = vld [vmem:[#allocation2 + $0x14] sm:$0xf]  ;;  %v806_v46 = vor.u32 %v929_v44, %v805_v43  ;;  %v807_v47 = vld [vmem:[#allocation2 + $0x18] sm:$0xf0]  ;;  %v797_v49 = vld [vmem:[#allocation2] sm:$0xf] }
  0x1f   : > { %490 = vmatpush.bf16.msra.mxu2 %v842_v21  ;;  %v810_v48 = vor.u32 %v928_v45, %v807_v47  ;;  %v927_v50 = vld [vmem:[#allocation2 + $0x4] sm:$0xf0]  ;;  %v926_v51 = vld [vmem:[#allocation2 + $0x4] sm:$0xf]  ;;  %v799_v53 = vld [vmem:[#allocation2 + $0x8] sm:$0xf0] }
  0x20   : > { %v798_v52 = vor.u32 %v927_v50, %v797_v49  ;;  %v802_v54 = vor.u32 %v926_v51, %v799_v53  ;;  %v948_v58 = vld [vmem:[#allocation4 + $0x30] sm:$0xff]  ;;  %v991_v60 = vld [vmem:[%s1193_s2] ss:$0 sm:$0xff]  ;;  %v955_v62 = vld [vmem:[#allocation4 + $0x68] sm:$0xff] }
  0x21   : > { %v956_v59 = vld [vmem:[#allocation4 + $0x70] sm:$0xff]  ;;  %648 = vmatpush.bf16.msra.mxu3 %v948_v58  ;;  %v946_v2 = vld [vmem:[#allocation4 + $0x20] sm:$0xff]  ;;  %v945_v13 = vld [vmem:[#allocation4 + $0x18] sm:$0xff] }
  0x22   : > { %472 = vmatpush.bf16.msra.mxu1 %v830_v26  ;;  %667 = vmatpush.bf16.msrb.mxu0 %v956_v59  ;;  %v954_v14 = vld [vmem:[#allocation4 + $0x60] sm:$0xff]  ;;  %v944_v15 = vld [vmem:[#allocation4 + $0x10] sm:$0xff]  ;;  %v953_v16 = vld [vmem:[#allocation4 + $0x58] sm:$0xff] }
  0x23   : > { %491 = vmatpush.bf16.msra.mxu2 %v834_v29  ;;  %v943_v17 = vld [vmem:[#allocation4 + $0x8] sm:$0xff]  ;;  %v952_v18 = vld [vmem:[#allocation4 + $0x50] sm:$0xff]  ;;  %v942_v19 = vld [vmem:[#allocation4] sm:$0xff] }
  0x24   : > { %v951_v20 = vld [vmem:[#allocation4 + $0x48] sm:$0xff]  ;;  %v950_v21 = vld [vmem:[#allocation4 + $0x40] sm:$0xff] }
  0x25   : > { %649 = vmatpush.bf16.msra.mxu3 %v947_v61  ;;  %v383_v22 = vld [vmem:[%s1195_s4] sm:$0x3] }
  0x26   : > { %473 = vmatpush.bf16.msra.mxu1 %v822_v34  ;;  %668 = vmatpush.bf16.msrb.mxu0 %v955_v62  ;;  %v385_v24 = vperm.slane %v383_v22, 0  ;;  %v386_v28 = vperm.slane %v383_v22, 1  ;;  %v992_v53 = vld [vmem:[%s1197_s6] ss:$0 sm:$0xff] }
  0x27   : > { %492 = vmatpush.bf16.msra.mxu2 %v826_v36 }
  0x29   : > { %650 = vmatpush.bf16.msra.mxu3 %v946_v2 }
  0x2a   : > { %474 = vmatpush.bf16.msra.mxu1 %v814_v40  ;;  %669 = vmatpush.bf16.msrb.mxu0 %v954_v14 }
  0x2b   : > { %794 = vmatmul.msk.bf16.gmra.mxu0 %vm335_vm0, %v322_v30  ;;  %493 = vmatpush.bf16.msra.mxu2 %v818_v42 }
  0x2d   : > { %651 = vmatpush.bf16.msra.mxu3 %v945_v13 }
  0x2e   : > { %475 = vmatpush.bf16.msra.mxu1 %v806_v46  ;;  %670 = vmatpush.bf16.msrb.mxu0 %v953_v16 }
  0x2f   : > { %494 = vmatpush.bf16.msra.mxu2 %v810_v48 }
  0x31   : > { %652 = vmatpush.bf16.msra.mxu3 %v944_v15 }
  0x32   : > { %476 = vmatpush.bf16.msra.mxu1 %v798_v52  ;;  %671 = vmatpush.bf16.msrb.mxu0 %v952_v18 }
  0x33   : > { %495 = vmatpush.bf16.msra.mxu2 %v802_v54 }
  0x35   : > { %653 = vmatpush.bf16.msra.mxu3 %v943_v17 }
  0x36   : > { %672 = vmatpush.bf16.msrb.mxu0 %v951_v20 }
  0x39   : > { %654 = vmatpush.bf16.msra.mxu3 %v942_v19 }
  0x3a   : > { %673 = vmatpush.bf16.msrb.mxu0 %v950_v21 }
  0x98   : > { %v351_v57 = vpop.f32.mrf.mxu0 }
  0x99   : > { %v352_v63 = vadd.f32 %v991_v60, %v351_v57 }
  0x9b   : > { %v361_v3 = vmax.f32 %v352_v63, 0.0 }
  0xa0   : > { %v353_v0 = vpop.f32.mrf.mxu0 }
  0xa1   : > { %v354_v1 = vadd.f32 %v991_v60, %v353_v0 }
  0xa3   : > { %v362_v4 = vmax.f32 %v354_v1, 0.0 }
  0xa5   : > { %v365_v5 = vpack.c.bf16 %v362_v4, %v361_v3 }
  0xa7   : > { %477 = vmatmul.bf16.vlgmr.msra.gmra.mxu1 %v365_v5  ;;  %496 = vmatmul.bf16.vlgmr.msra.gmra.mxu2 %v365_v5 }
  0xa8   : > { %v356_v6 = vpop.f32.mrf.mxu0 }
  0xa9   : > { %v357_v7 = vadd.f32 %v991_v60, %v356_v6 }
  0xab   : > { %v363_v10 = vmax.f32 %v357_v7, 0.0 }
  0xb0   : > { %v358_v8 = vpop.f32.mrf.mxu0 }
  0xb1   : > { %v359_v9 = vadd.f32 %v991_v60, %v358_v8 }
  0xb3   : > { %v364_v11 = vmax.f32 %v359_v9, 0.0 }
  0xb5   : > { %v366_v12 = vpack.c.bf16 %v364_v11, %v363_v10 }
  0xb7   : > { %482 = vmatmul.bf16.gmra.mxu1 %v366_v12  ;;  %501 = vmatmul.bf16.gmra.mxu2 %v366_v12 }
 0x124   : > { %v478_v23 = vpop.f32.mrf.mxu1 }
 0x125   : > { %v479_v26 = vadd.f32 %v478_v23, %v385_v24 }
 0x127   : > { %v507_v30 = vmax.f32 %v479_v26, 0.0 }
 0x12a   : > { %v497_v25 = vpop.f32.mrf.mxu2 }
 0x12b   : > { %v498_v32 = vadd.f32 %v497_v25, %v386_v28 }
 0x12c   : > { %v480_v27 = vpop.f32.mrf.mxu1 }
 0x12d   : > { %v481_v29 = vadd.f32 %v480_v27, %v385_v24  ;;  %v508_v37 = vmax.f32 %v498_v32, 0.0 }
 0x12f   : > { %v509_v31 = vmax.f32 %v481_v29, 0.0 }
 0x131   : > { %v515_v33 = vpack.c.bf16 %v509_v31, %v507_v30 }
 0x132   : > { %v499_v34 = vpop.f32.mrf.mxu2 }
 0x133   : > { %v500_v35 = vadd.f32 %v499_v34, %v386_v28  ;;  %655 = vmatmul.bf16.vlgmr.msra.gmra.mxu3 %v515_v33 }
 0x134   : > { %v483_v36 = vpop.f32.mrf.mxu1 }
 0x135   : > { %v510_v38 = vmax.f32 %v500_v35, 0.0  ;;  %v484_v41 = vadd.f32 %v483_v36, %v385_v24 }
 0x137   : > { %v516_v39 = vpack.c.bf16 %v510_v38, %v508_v37  ;;  %v511_v44 = vmax.f32 %v484_v41, 0.0 }
 0x139   : > { %674 = vmatmul.bf16.vlgmr.msrb.gmra.mxu0 %v516_v39 }
 0x13a   : > { %v502_v40 = vpop.f32.mrf.mxu2 }
 0x13b   : > { %v503_v46 = vadd.f32 %v502_v40, %v386_v28 }
 0x13c   : > { %v485_v42 = vpop.f32.mrf.mxu1 }
 0x13d   : > { %v486_v43 = vadd.f32 %v485_v42, %v385_v24  ;;  %v512_v50 = vmax.f32 %v503_v46, 0.0 }
 0x13f   : > { %v513_v45 = vmax.f32 %v486_v43, 0.0 }
 0x141   : > { %v517_v47 = vpack.c.bf16 %v513_v45, %v511_v44 }
 0x142   : > { %v504_v48 = vpop.f32.mrf.mxu2 }
 0x143   : > { %v505_v49 = vadd.f32 %v504_v48, %v386_v28  ;;  %660 = vmatmul.bf16.gmra.mxu3 %v517_v47 }
 0x145   : > { %v514_v51 = vmax.f32 %v505_v49, 0.0 }
 0x147   : > { %v518_v52 = vpack.c.bf16 %v514_v51, %v512_v50 }
 0x149   : > { %679 = vmatmul.bf16.gmra.mxu0 %v518_v52 }
 0x1b6   : > { %v656_v54 = vpop.f32.mrf.mxu3  ;;  %v675_v55 = vpop.f32.mrf.mxu0 }
 0x1b7   : > { %v676_v56 = vadd.f32 %v675_v55, %v656_v54 }
 0x1b9   : > { %v689_v57 = vadd.f32 %v992_v53, %v676_v56 }
 0x1bb   : > { %694 = vst.msk [vmem:[%s314_s12] sm:$0xff] %vm693_vm1, %v689_v57 }
 0x1be   : > { %v658_v58 = vpop.f32.mrf.mxu3  ;;  %v677_v59 = vpop.f32.mrf.mxu0 }
 0x1bf   : > { %v678_v60 = vadd.f32 %v677_v59, %v658_v58 }
 0x1c1   : > { %v690_v61 = vadd.f32 %v992_v53, %v678_v60 }
 0x1c3   : > { %695 = vst.msk [vmem:[%s314_s12 + $0x8] sm:$0xff] %vm693_vm1, %v690_v61 }
 0x1c6   : > { %v661_v62 = vpop.f32.mrf.mxu3  ;;  %v680_v63 = vpop.f32.mrf.mxu0 }
 0x1c7   : > { %v681_v0 = vadd.f32 %v680_v63, %v661_v62 }
 0x1c9   : > { %v691_v1 = vadd.f32 %v992_v53, %v681_v0 }
 0x1cb   : > { %696 = vst.msk [vmem:[%s314_s12 + $0x10] sm:$0xff] %vm693_vm1, %v691_v1 }
 0x1ce   : > { %v663_v2 = vpop.f32.mrf.mxu3  ;;  %v682_v3 = vpop.f32.mrf.mxu0 }
 0x1cf   : > { %v683_v4 = vadd.f32 %v682_v3, %v663_v2 }
 0x1d1   : > { %v692_v5 = vadd.f32 %v992_v53, %v683_v4 }
 0x1d3   : > { %697 = vst.msk [vmem:[%s314_s12 + $0x18] sm:$0xff] %vm693_vm1, %v692_v5 }
 0x1d4 PF: > { %s19_s24 = sadd.s32 1, %s1067_s24  }
 0x1d5   : > { %p16_p7 = scmp.ge.s32.totalorder %s19_s24, 4  }
 0x1d7   :  { %18 = sbr.rel (!%p16_p7) target bundleno = 2 (0x2), region = 87 }
 0x1dc   :  { %720 = vsyncpa [#allocation3], 1 }
 0x1dd   :  { %722 = vsyncpa [#allocation3 + $0x1], 1 }
 0x1de   :  { %723 = vsyncpa [#allocation5], 1 }

</bundles_post_ra>
